<compile_context>
chip_gen: v7x
topology: tpu7x:2x2x1
jax: 0.10.0
libtpu: 0.0.40
codegen_flags: <defaults>
</compile_context>

<pallas_src>
import functools

import jax
import jax.numpy as jnp
from jax.experimental import pallas as pl
from jax.experimental.pallas import tpu as pltpu

NEG_INF = -1e30
VMEM_LIMIT = 32 * 1024 * 1024  # safe on v5e/v6e (128 MiB) and v7x (64 MiB)


def _round_up(x, m):
    return ((x + m - 1) // m) * m


def _choose_tile(dim, pref, granule):
    """Largest tile <= pref that is a multiple of `granule` and divides `dim`,
    or the full dim (always legal for BlockSpec) otherwise."""
    if dim <= pref:
        return dim
    t = (min(pref, dim) // granule) * granule
    while t >= granule:
        if dim % t == 0:
            return t
        t -= granule
    return dim


# --------------------------------------------------------------------------
# Pallas kernel 1: tiled dense matmul (+ optional ReLU / fused residual add)
#   bf16 operands, f32 VMEM accumulator, K-axis as the innermost grid axis.
# --------------------------------------------------------------------------
def _dense_kernel(x_ref, w_ref, *rest, activation, n_k, has_residual):
    if has_residual:
        r_ref, o_ref, acc_ref = rest
    else:
        o_ref, acc_ref = rest

    k = pl.program_id(2)

    @pl.when(k == 0)
    def _():
        acc_ref[...] = jnp.zeros_like(acc_ref)

    acc_ref[...] += jnp.dot(x_ref[...], w_ref[...],
                            preferred_element_type=jnp.float32)

    @pl.when(k == n_k - 1)
    def _():
        y = acc_ref[...]
        if activation == "relu":
            y = jnp.maximum(y, 0.0)
        if has_residual:
            y = y + r_ref[...].astype(jnp.float32)
        o_ref[...] = y.astype(o_ref.dtype)


def dense(x, w, activation=None, residual=None, out_dtype=jnp.bfloat16):
    M, K = x.shape
    K2, N = w.shape
    assert K == K2
    x = x.astype(jnp.bfloat16)
    w = w.astype(jnp.bfloat16)
    has_residual = residual is not None

    # v6e/v7x prefer 256-multiples for N/K (2x256^2 MXU); 128 is the hard
    # lane granule and still fine on v5e.  Small dims fall back to full size.
    tm = _choose_tile(M, 256, 8)
    tn = _choose_tile(N, 256, 128)
    tk = _choose_tile(K, 512, 128)
    grid = (M // tm, N // tn, K // tk)
    n_k = grid[2]

    in_specs = [
        pl.BlockSpec((tm, tk), lambda i, j, k: (i, k)),
        pl.BlockSpec((tk, tn), lambda i, j, k: (k, j)),
    ]
    operands = [x, w]
    if has_residual:
        in_specs.append(pl.BlockSpec((tm, tn), lambda i, j, k: (i, j)))
        operands.append(residual.astype(jnp.bfloat16))

    out_bytes = M * N * jnp.dtype(out_dtype).itemsize
    bytes_accessed = (M * K + K * N) * 2 + out_bytes + (M * N * 2 if has_residual else 0)

    return pl.pallas_call(
        functools.partial(_dense_kernel, activation=activation, n_k=n_k,
                          has_residual=has_residual),
        grid=grid,
        in_specs=in_specs,
        out_specs=pl.BlockSpec((tm, tn), lambda i, j, k: (i, j)),
        out_shape=jax.ShapeDtypeStruct((M, N), out_dtype),
        scratch_shapes=[pltpu.VMEM((tm, tn), jnp.float32)],
        compiler_params=pltpu.CompilerParams(
            dimension_semantics=("parallel", "parallel", "arbitrary"),
            vmem_limit_bytes=VMEM_LIMIT),
        cost_estimate=pl.CostEstimate(
            flops=2 * M * N * K, transcendentals=0,
            bytes_accessed=int(bytes_accessed)),
    )(*operands)


# --------------------------------------------------------------------------
# Pallas kernel 2: fused FFN  out = h + relu(h @ w1) @ w2
#   Grid over (M tiles, F chunks); hidden dim D kept whole per tile.
# --------------------------------------------------------------------------
def _ffn_kernel(h_ref, w1_ref, w2_ref, o_ref, acc_ref, *, n_f):
    f = pl.program_id(1)

    @pl.when(f == 0)
    def _():
        acc_ref[...] = h_ref[...].astype(jnp.float32)   # residual init

    a = jnp.dot(h_ref[...], w1_ref[...], preferred_element_type=jnp.float32)
    a = jnp.maximum(a, 0.0).astype(jnp.bfloat16)
    acc_ref[...] += jnp.dot(a, w2_ref[...], preferred_element_type=jnp.float32)

    @pl.when(f == n_f - 1)
    def _():
        o_ref[...] = acc_ref[...].astype(o_ref.dtype)


def ffn(h, w1, w2):
    M, D = h.shape
    D2, F = w1.shape
    assert D == D2 and w2.shape == (F, D)
    h = h.astype(jnp.bfloat16)
    w1 = w1.astype(jnp.bfloat16)
    w2 = w2.astype(jnp.bfloat16)

    tm = _choose_tile(M, 256, 8)
    tf = _choose_tile(F, 512, 128)
    grid = (M // tm, F // tf)
    n_f = grid[1]

    bytes_accessed = (M * D + D * F + F * D + M * D) * 2

    return pl.pallas_call(
        functools.partial(_ffn_kernel, n_f=n_f),
        grid=grid,
        in_specs=[
            pl.BlockSpec((tm, D), lambda i, f: (i, 0)),
            pl.BlockSpec((D, tf), lambda i, f: (0, f)),
            pl.BlockSpec((tf, D), lambda i, f: (f, 0)),
        ],
        out_specs=pl.BlockSpec((tm, D), lambda i, f: (i, 0)),
        out_shape=jax.ShapeDtypeStruct((M, D), jnp.bfloat16),
        scratch_shapes=[pltpu.VMEM((tm, D), jnp.float32)],
        compiler_params=pltpu.CompilerParams(
            dimension_semantics=("parallel", "arbitrary"),
            vmem_limit_bytes=VMEM_LIMIT),
        cost_estimate=pl.CostEstimate(
            flops=4 * M * D * F, transcendentals=0,
            bytes_accessed=int(bytes_accessed)),
    )(h, w1, w2)


# --------------------------------------------------------------------------
# Pallas kernel 3: gated local-causal + KNN-memory attention, head-blocked.
#   q/k/v: [B, H, S, Dh]; memory: [B, H, Mcap, Dh] but only the valid prefix
#   (rounded up to the 8-sublane tile) is ever DMA'd.  Output is written as
#   [B, S, H*Dh] so the head dim is already folded into lanes (no post-kernel
#   transpose).  Gate lives in SMEM; the memory branch is omitted entirely
#   (statically) while the memory is empty.
# --------------------------------------------------------------------------
def _knn_attn_kernel(gate_ref, q_ref, k_ref, v_ref, *rest,
                     Hb, use_memory, mem_len):
    if use_memory:
        km_ref, vm_ref, o_ref = rest
    else:
        (o_ref,) = rest

    S, Dh = q_ref.shape[2], q_ref.shape[3]
    scale = 1.0 / (Dh ** 0.5)

    q = q_ref[0]                                           # [Hb, S, Dh] bf16
    k = k_ref[0]
    v = v_ref[0]

    # local causal self-attention within the segment (bf16 MXU, f32 acc)
    s_loc = jnp.einsum("hqd,hkd->hqk", q, k,
                       preferred_element_type=jnp.float32) * scale
    row = jax.lax.broadcasted_iota(jnp.int32, (Hb, S, S), 1)
    col = jax.lax.broadcasted_iota(jnp.int32, (Hb, S, S), 2)
    s_loc = jnp.where(col <= row, s_loc, NEG_INF)
    m_loc = jnp.max(s_loc, axis=-1, keepdims=True)
    e_loc = jnp.exp(s_loc - m_loc)
    p_loc = e_loc * pl.reciprocal(jnp.sum(e_loc, axis=-1, keepdims=True),
                                  approx=True)
    loc_out = jnp.einsum("hqk,hkd->hqd", p_loc.astype(jnp.bfloat16), v,
                         preferred_element_type=jnp.float32)   # [Hb, S, Dh]

    if use_memory:
        # attention over the valid memory prefix
        # TODO(synk): exact faiss-style top-k retrieval has no clean Pallas
        # equivalent; masked full attention over the valid prefix is used.
        Mu = km_ref.shape[2]
        km = km_ref[0]
        vm = vm_ref[0]
        s_mem = jnp.einsum("hqd,hkd->hqk", q, km,
                           preferred_element_type=jnp.float32) * scale
        if Mu > mem_len:   # only when the prefix was rounded up to 8 sublanes
            mcol = jax.lax.broadcasted_iota(jnp.int32, (Hb, S, Mu), 2)
            s_mem = jnp.where(mcol < mem_len, s_mem, NEG_INF)
        m_mem = jnp.max(s_mem, axis=-1, keepdims=True)
        e_mem = jnp.exp(s_mem - m_mem)
        p_mem = e_mem * pl.reciprocal(jnp.sum(e_mem, axis=-1, keepdims=True),
                                      approx=True)
        mem_out = jnp.einsum("hqk,hkd->hqd", p_mem.astype(jnp.bfloat16), vm,
                             preferred_element_type=jnp.float32)

    hblk = pl.program_id(1)
    for hh in range(Hb):   # static unroll over heads in the block
        if use_memory:
            g = gate_ref[hblk * Hb + hh]                  # SMEM scalar
            o_h = g * mem_out[hh] + (1.0 - g) * loc_out[hh]
        else:
            o_h = loc_out[hh]
        o_ref[0, :, hh * Dh:(hh + 1) * Dh] = o_h.astype(o_ref.dtype)


def _choose_head_block(H, Dh, S, mem_used):
    budget = 6 * 1024 * 1024  # rough f32 working-set budget per grid step

    def work(hb):
        return 4 * hb * (4 * S * Dh + 2 * mem_used * Dh + 2 * S * S + 2 * S * mem_used)

    if work(H) <= budget:
        return H
    for hb in range(H - 1, 0, -1):
        if H % hb == 0 and (hb * Dh) % 128 == 0 and work(hb) <= budget:
            return hb
    return H  # full-H block is always BlockSpec-legal; only pipelining suffers


def knn_attention(q, k, v, k_mem, v_mem, gate, mem_len):
    """q,k,v: [B,H,S,Dh]; k_mem,v_mem: [B,H,Mcap,Dh]; gate: [H] f32;
    mem_len: static Python int (valid memory length).  Returns [B,S,H*Dh]."""
    B, H, S, Dh = q.shape
    Mcap = k_mem.shape[2]
    use_memory = mem_len > 0
    mem_used = min(_round_up(mem_len, 8), Mcap) if use_memory else 0

    Hb = _choose_head_block(H, Dh, S, mem_used)
    grid = (B, H // Hb)

    in_specs = [
        pl.BlockSpec(memory_space=pltpu.MemorySpace.SMEM),            # gate
        pl.BlockSpec((1, Hb, S, Dh), lambda b, h: (b, h, 0, 0)),      # q
        pl.BlockSpec((1, Hb, S, Dh), lambda b, h: (b, h, 0, 0)),      # k
        pl.BlockSpec((1, Hb, S, Dh), lambda b, h: (b, h, 0, 0)),      # v
    ]
    operands = [gate.astype(jnp.float32), q, k, v]
    if use_memory:
        in_specs += [
            pl.BlockSpec((1, Hb, mem_used, Dh), lambda b, h: (b, h, 0, 0)),
            pl.BlockSpec((1, Hb, mem_used, Dh), lambda b, h: (b, h, 0, 0)),
        ]
        operands += [k_mem, v_mem]

    flops = B * H * (4 * S * S * Dh + 4 * S * mem_used * Dh)
    transc = B * H * S * (S + mem_used)
    bytes_accessed = (3 * B * H * S * Dh + 2 * B * H * mem_used * Dh
                      + B * S * H * Dh) * 2

    return pl.pallas_call(
        functools.partial(_knn_attn_kernel, Hb=Hb, use_memory=use_memory,
                          mem_len=mem_len),
        grid=grid,
        in_specs=in_specs,
        out_specs=pl.BlockSpec((1, S, Hb * Dh), lambda b, h: (b, 0, h)),
        out_shape=jax.ShapeDtypeStruct((B, S, H * Dh), jnp.bfloat16),
        compiler_params=pltpu.CompilerParams(
            dimension_semantics=("parallel", "parallel"),
            vmem_limit_bytes=VMEM_LIMIT),
        cost_estimate=pl.CostEstimate(
            flops=int(flops), transcendentals=int(transc),
            bytes_accessed=int(bytes_accessed)),
    )(*operands)


# --------------------------------------------------------------------------
# Pallas kernel 4: in-place KV-memory append (aliased output, O(S) traffic)
# --------------------------------------------------------------------------
def _kv_append_kernel(kmem_hbm, vmem_hbm, knew_ref, vnew_ref, kout_ref, vout_ref):
    del kmem_hbm, vmem_hbm   # aliased; regions outside the written block keep old data
    kout_ref[...] = knew_ref[...]
    vout_ref[...] = vnew_ref[...]


def kv_memory_append(k_mem, v_mem, k_new, v_new, mem_len):
    B, H, Mcap, Dh = k_mem.shape
    S = k_new.shape[2]
    if S % 8 != 0 or mem_len % S != 0:
        # TODO(synk): odd segment lengths fall back to a full-copy update.
        k_mem = jax.lax.dynamic_update_slice(k_mem, k_new, (0, 0, mem_len, 0))
        v_mem = jax.lax.dynamic_update_slice(v_mem, v_new, (0, 0, mem_len, 0))
        return k_mem, v_mem

    seg_idx = mem_len // S
    return pl.pallas_call(
        _kv_append_kernel,
        grid=(B,),
        in_specs=[
            pl.BlockSpec(memory_space=pl.ANY),                       # k_mem (aliased)
            pl.BlockSpec(memory_space=pl.ANY),                       # v_mem (aliased)
            pl.BlockSpec((1, H, S, Dh), lambda b: (b, 0, 0, 0)),     # k_new
            pl.BlockSpec((1, H, S, Dh), lambda b: (b, 0, 0, 0)),     # v_new
        ],
        out_specs=[
            pl.BlockSpec((1, H, S, Dh), lambda b: (b, 0, seg_idx, 0)),
            pl.BlockSpec((1, H, S, Dh), lambda b: (b, 0, seg_idx, 0)),
        ],
        out_shape=[
            jax.ShapeDtypeStruct(k_mem.shape, k_mem.dtype),
            jax.ShapeDtypeStruct(v_mem.shape, v_mem.dtype),
        ],
        input_output_aliases={0: 0, 1: 1},
        compiler_params=pltpu.CompilerParams(
            dimension_semantics=("parallel",)),
    )(k_mem, v_mem, k_new, v_new)


# --------------------------------------------------------------------------
# Synthetic RememBert segment module (params + per-segment forward)
# --------------------------------------------------------------------------
def make_params(key, vocab, d_model, n_heads, d_head, d_ff):
    ks = jax.random.split(key, 7)
    s = 0.02
    bf = jnp.bfloat16
    return dict(
        embed=(jax.random.normal(ks[0], (vocab, d_model), jnp.float32) * s).astype(bf),
        w_qkv=(jax.random.normal(ks[1], (d_model, 3 * n_heads * d_head), jnp.float32) * s).astype(bf),
        w_o=(jax.random.normal(ks[2], (n_heads * d_head, d_model), jnp.float32) * s).astype(bf),
        w_ff1=(jax.random.normal(ks[3], (d_model, d_ff), jnp.float32) * s).astype(bf),
        w_ff2=(jax.random.normal(ks[4], (d_ff, d_model), jnp.float32) * s).astype(bf),
        w_lm=(jax.random.normal(ks[5], (d_model, vocab), jnp.float32) * s).astype(bf),
        gate=jax.nn.sigmoid(jax.random.normal(ks[6], (n_heads,), jnp.float32)),
    )


def segment_forward(params, ids_seg, labels_seg, k_mem, v_mem, mem_len,
                    n_heads, d_head):
    B, S = ids_seg.shape
    V, D = params["embed"].shape
    H, Dh = n_heads, d_head

    x = jnp.take(params["embed"], ids_seg, axis=0)                  # [B, S, D] bf16
    x_flat = x.reshape(B * S, D)

    qkv = dense(x_flat, params["w_qkv"])                            # [B*S, 3*H*Dh] bf16
    qkv = qkv.reshape(B, S, 3, H, Dh)
    q = qkv[:, :, 0].transpose(0, 2, 1, 3)                          # [B, H, S, Dh]
    k = qkv[:, :, 1].transpose(0, 2, 1, 3)
    v = qkv[:, :, 2].transpose(0, 2, 1, 3)

    attn = knn_attention(q, k, v, k_mem, v_mem, params["gate"], mem_len)
    # attn: [B, S, H*Dh] (head dim already folded -> no post-kernel transpose)

    h = dense(attn.reshape(B * S, H * Dh), params["w_o"], residual=x_flat)
    h = ffn(h, params["w_ff1"], params["w_ff2"])                    # +residual inside
    logits = dense(h, params["w_lm"], out_dtype=jnp.float32).reshape(B, S, V)

    loss = None
    if labels_seg is not None:
        logp = jax.nn.log_softmax(logits, axis=-1)
        nll = -jnp.take_along_axis(logp, labels_seg[..., None], axis=-1)[..., 0]
        loss = jnp.mean(nll)

    # append this segment's (k, v) to the KNN memory (in place, aliased)
    Mcap = k_mem.shape[2]
    if mem_len + S <= Mcap:
        k_mem, v_mem = kv_memory_append(k_mem, v_mem, k, v, mem_len)
        new_mem_len = mem_len + S
    else:
        # TODO(synk): reference KNN memory evicts oldest entries when full;
        # here we simply stop appending once capacity is reached.
        new_mem_len = mem_len

    return loss, logits, k_mem, v_mem, new_mem_len


# --------------------------------------------------------------------------
# The long-document wrapper (mirrors RememBertLongDocumentWrapper.forward)
# --------------------------------------------------------------------------
class RememBertLongDocumentWrapper:
    def __init__(self, params, n_heads, d_head, max_seq_len=8,
                 max_train_segments=5, mem_capacity=None):
        self.params = params
        self.n_heads = n_heads
        self.d_head = d_head
        self.max_seq_len = max_seq_len
        self.max_train_segments = max_train_segments
        self.mem_capacity = (mem_capacity if mem_capacity is not None
                             else max_train_segments * max_seq_len)
        self.training = False

    def __call__(self, input_ids, labels=None, return_dict=True):
        B, L = input_ids.shape
        S = self.max_seq_len
        n_seg = (L + S - 1) // S

        # _split_batch_into_segments: split along dim=1 into max_seq_len chunks
        segments = []
        for i in range(n_seg):
            ids_seg = input_ids[:, i * S:(i + 1) * S]
            lab_seg = None if labels is None else labels[:, i * S:(i + 1) * S]
            segments.append((ids_seg, lab_seg))
        if self.training and self.max_train_segments:
            segments = segments[: self.max_train_segments]

        # knn_memories_context: zero-initialized memory shared across segments
        k_mem = jnp.zeros((B, self.n_heads, self.mem_capacity, self.d_head),
                          jnp.bfloat16)
        v_mem = jnp.zeros_like(k_mem)
        mem_len = 0

        losses, logits_list = [], []
        for ids_seg, lab_seg in segments:
            loss, logits, k_mem, v_mem, mem_len = segment_forward(
                self.params, ids_seg, lab_seg, k_mem, v_mem, mem_len,
                self.n_heads, self.d_head)
            if loss is not None:
                losses.append(loss)
            logits_list.append(logits)

        # _gather_results_from_dicts: cat along dim=1, loss = sum / len
        out_logits = jnp.concatenate(logits_list, axis=1)
        if return_dict:
            out = {"logits": out_logits}
            if losses:
                out["loss"] = sum(losses) / len(losses)
            return out
        else:
            head = (sum(losses) / len(losses),) if losses else ()
            return head + (out_logits,)


if __name__ == "__main__":
    key = jax.random.PRNGKey(0)
    B, L, V, D, H, Dh, F = 2, 24, 64, 32, 2, 16, 64
    max_seq_len, max_train_segments = 8, 5

    pkey, ikey, lkey = jax.random.split(key, 3)
    params = make_params(pkey, V, D, H, Dh, F)
    input_ids = jax.random.randint(ikey, (B, L), 0, V, dtype=jnp.int32)
    labels = jax.random.randint(lkey, (B, L), 0, V, dtype=jnp.int32)

    model = RememBertLongDocumentWrapper(
        params, n_heads=H, d_head=Dh, max_seq_len=max_seq_len,
        max_train_segments=max_train_segments,
        mem_capacity=max_train_segments * max_seq_len)

    out = model(input_ids, labels=labels, return_dict=True)
    jax.block_until_ready(out["logits"])
    jax.block_until_ready(out["loss"])
    assert out["logits"].shape == (B, L, V)
    assert out["loss"].shape == ()
    print("KERNEL_OK")
</pallas_src>

<mosaic_0001>
module attributes {stable_mosaic.version = 11 : i64} {
  func.func @_dense_kernel(%arg0: i32, %arg1: i32, %arg2: i32, %arg3: memref<16x32xbf16, #tpu.memory_space<vmem>>, %arg4: memref<32x96xbf16, #tpu.memory_space<vmem>>, %arg5: memref<16x96xbf16, #tpu.memory_space<vmem>>, %arg6: memref<16x96xf32, #tpu.memory_space<vmem>>) attributes {dimension_semantics = [#tpu.dimension_semantics<parallel>, #tpu.dimension_semantics<parallel>, #tpu.dimension_semantics<arbitrary>], iteration_bounds = array<i64: 1, 1, 1>, scalar_prefetch = 0 : i64, scratch_operands = 1 : i64, tpu.core_type = #tpu.core_type<tc>, window_params = [{transform_indices = @transform_0, window_bounds = array<i64: 16, 32>}, {transform_indices = @transform_1, window_bounds = array<i64: 32, 96>}, {transform_indices = @transform_2, window_bounds = array<i64: 16, 96>}]} {
    %c0_i32 = arith.constant 0 : i32
    %0 = arith.cmpi eq, %arg2, %c0_i32 : i32
    %1 = arith.extui %0 : i1 to i32
    %c0_i32_0 = arith.constant 0 : i32
    %2 = arith.cmpi ne, %1, %c0_i32_0 : i32
    scf.if %2 {
      %cst_10 = arith.constant 0.000000e+00 : f32
      %12 = vector.broadcast %cst_10 : f32 to vector<16x96xf32>
      %c0_11 = arith.constant 0 : index
      %c0_12 = arith.constant 0 : index
      %13 = vector.load %arg6[%c0_11, %c0_12] : memref<16x96xf32, #tpu.memory_space<vmem>>, vector<16x96xf32>
      tpu.vector_store %arg6[%c0_11, %c0_12], %12 {strides = array<i32>} : memref<16x96xf32, #tpu.memory_space<vmem>>, vector<16x96xf32>,
    } else {
    }
    %c0 = arith.constant 0 : index
    %c0_1 = arith.constant 0 : index
    %3 = vector.load %arg6[%c0, %c0_1] : memref<16x96xf32, #tpu.memory_space<vmem>>, vector<16x96xf32>
    %c0_2 = arith.constant 0 : index
    %c0_3 = arith.constant 0 : index
    %4 = vector.load %arg3[%c0_2, %c0_3] : memref<16x32xbf16, #tpu.memory_space<vmem>>, vector<16x32xbf16>
    %c0_4 = arith.constant 0 : index
    %c0_5 = arith.constant 0 : index
    %5 = vector.load %arg4[%c0_4, %c0_5] : memref<32x96xbf16, #tpu.memory_space<vmem>>, vector<32x96xbf16>
    %cst = arith.constant dense<0.000000e+00> : vector<16x96xf32>
    %6 = tpu.matmul %4, %5, %cst {dimension_numbers = #tpu.dot_dimension_numbers<[1], [0], [0], [1], [0, 0, 1, 1], [], []>} : vector<16x32xbf16>, vector<32x96xbf16>, vector<16x96xf32> -> vector<16x96xf32>
    %7 = arith.addf %3, %6 : vector<16x96xf32>
    %c0_6 = arith.constant 0 : index
    %c0_7 = arith.constant 0 : index
    %8 = vector.load %arg6[%c0_6, %c0_7] : memref<16x96xf32, #tpu.memory_space<vmem>>, vector<16x96xf32>
    tpu.vector_store %arg6[%c0_6, %c0_7], %7 {strides = array<i32>} : memref<16x96xf32, #tpu.memory_space<vmem>>, vector<16x96xf32>,
    %c0_i32_8 = arith.constant 0 : i32
    %9 = arith.cmpi eq, %arg2, %c0_i32_8 : i32
    %10 = arith.extui %9 : i1 to i32
    %c0_i32_9 = arith.constant 0 : i32
    %11 = arith.cmpi ne, %10, %c0_i32_9 : i32
    scf.if %11 {
      %c0_10 = arith.constant 0 : index
      %c0_11 = arith.constant 0 : index
      %12 = vector.load %arg6[%c0_10, %c0_11] : memref<16x96xf32, #tpu.memory_space<vmem>>, vector<16x96xf32>
      %13 = arith.truncf %12 : vector<16x96xf32> to vector<16x96xbf16>
      %c0_12 = arith.constant 0 : index
      %c0_13 = arith.constant 0 : index
      %14 = vector.load %arg5[%c0_12, %c0_13] : memref<16x96xbf16, #tpu.memory_space<vmem>>, vector<16x96xbf16>
      tpu.vector_store %arg5[%c0_12, %c0_13], %13 {strides = array<i32>} : memref<16x96xbf16, #tpu.memory_space<vmem>>, vector<16x96xbf16>,
    } else {
    }
    return
  }
  func.func @transform_0(%arg0: i32, %arg1: i32, %arg2: i32) -> (i32, i32) {
    %c0_i32 = arith.constant 0 : i32
    return %arg0, %arg2 : i32, i32
  }
  func.func @transform_1(%arg0: i32, %arg1: i32, %arg2: i32) -> (i32, i32) {
    %c0_i32 = arith.constant 0 : i32
    return %arg2, %arg1 : i32, i32
  }
  func.func @transform_2(%arg0: i32, %arg1: i32, %arg2: i32) -> (i32, i32) {
    %c0_i32 = arith.constant 0 : i32
    return %arg0, %arg1 : i32, i32
  }
}

</mosaic_0001>

<bundles_post_ra>
// kernel: tpu_custom_call.1
= control target key start
LH: loop header
LB: loop body
LE: loop exit
PB: predicated region body
PF: predicated region fallthrough
CT: control target
= control target key end

     0   :  { %7 = vsyncpa [#allocation4], 0  ;;  %s329_s0 = inlined_call_operand.hbm [shape: bf16[16,32], index: 0, kind: input, shape index: {}]   ;;  %s330_s1 = inlined_call_operand.hbm [shape: bf16[32,96], index: 1, kind: input, shape index: {}]   ;;  %s331_s2 = inlined_call_operand.hbm [shape: bf16[16,96], index: 2, kind: output, shape index: {}]  }
   0x1   :  { %8 = vsyncpa [#allocation7], 0 }
   0x2   :  { %9 = vsyncpa [#allocation5], 0  ;;  %s258_s9 = smov [#allocation3]   ;;  %s186_s13 = scalar_lea.hbm %s329_s0, 128 }
   0x3   :  { %s15_s10 = sshll.u32 %s258_s9, 4  ;;  %p187_p0 = scmp.ne.s32.totalorder %s329_s0, %s186_s13  ;;  %s16_s10 = int_to_ptr.vmem [resolvable:$true] %s15_s10 }
   0x4   :  { %p190_p1 = scmp.lt.u32.totalorder %s186_s13, %s329_s0 }
   0x6   :  { %p192_p2 = pnand %p190_p1, %p187_p0 }
   0x8   :  { %195 = shalt.err (!%p192_p2)
}
   0x9   :  { %s196_s18 = scalar_lea.vmem %s16_s10, 128  ;;  %p201_p4 = scmp.lt.s32.totalorder %s16_s10, %s16_s10 }
   0xa   :  { %p197_p3 = scmp.ne.s32.totalorder %s16_s10, %s196_s18  ;;  %p202_p5 = scmp.lt.s32.totalorder %s196_s18, %s196_s18 }
   0xc   :  { %p203_p6 = por %p202_p5, %p201_p4 }
   0xe   :  { %p204_p7 = pnand %p203_p6, %p197_p3 }
  0x10   :  { %207 = shalt.err (!%p204_p7)
}
  0x11   :  { %s259_s19 = smov 64   ;;  %s260_s20 = smov 4  }
  0x12   :  { %21 = dma.hbm_to_vmem [thread:$0]  %s329_s0, 128, %s16_s10, [#allocation4], %s259_s19, %s259_s19, %s260_s20  }
  0x13   :  { %s261_s23 = smov [#allocation6]   ;;  %s208_s27 = scalar_lea.hbm %s330_s1, 256 }
  0x14   :  { %s27_s24 = sshll.u32 %s261_s23, 4  ;;  %p209_p8 = scmp.ne.s32.totalorder %s330_s1, %s208_s27  ;;  %s28_s24 = int_to_ptr.vmem [resolvable:$true] %s27_s24 }
  0x15   :  { %p212_p9 = scmp.lt.u32.totalorder %s208_s27, %s330_s1 }
  0x17   :  { %p214_p10 = pnand %p212_p9, %p209_p8 }
  0x19   :  { %217 = shalt.err (!%p214_p10)
}
  0x1a   :  { %s218_s4 = scalar_lea.vmem %s28_s24, 256  ;;  %p223_p12 = scmp.lt.s32.totalorder %s28_s24, %s28_s24 }
  0x1b   :  { %p219_p11 = scmp.ne.s32.totalorder %s28_s24, %s218_s4  ;;  %p224_p13 = scmp.lt.s32.totalorder %s218_s4, %s218_s4 }
  0x1d   :  { %p225_p0 = por %p224_p13, %p223_p12 }
  0x1f   :  { %p226_p1 = pnand %p225_p0, %p219_p11 }
  0x21   :  { %229 = shalt.err (!%p226_p1)
}
  0x22   :  { %33 = dma.hbm_to_vmem [thread:$0]  %s330_s1, 256, %s28_s24, [#allocation7], %s259_s19, %s259_s19, %s260_s20  }
  0x23   :  { %252 = dma.done.wait [#allocation4], 128  }
  0x24   :  { %253 = vsyncadd [#allocation4], 4294967168 }
  0x25   :  { %254 = dma.done.wait [#allocation7], 256  }
  0x26   :  { %255 = vsyncadd [#allocation7], 4294967040  ;;  %vm45_vm0 = vcmask 785408   ;;  %v262_v0 = vmov 0.0   ;;  %vm263_vm1 = vmmov 0   ;;  %v183_v1 = vld [vmem:[#allocation6] sm:$0xff]  }
  0x27   :  { %46 = vst.msk [vmem:[#allocation2] sm:$0xff] %vm45_vm0, %v262_v0  ;;  %47 = vst.msk [vmem:[#allocation2 + $0x8] sm:$0xff] %vm45_vm0, %v262_v0  ;;  %168 = vmatprep.subr.bf16.mxu0 %v262_v0  ;;  %172 = vmatprep.mubr.msk.bf16.mxu0 %vm263_vm1, %v262_v0  ;;  %v184_v2 = vld [vmem:[#allocation6 + $0x8] sm:$0xff]   ;;  %v185_v3 = vld [vmem:[#allocation3] sm:$0xff]   ;;  %vm73_vm2 = vcmask 261120   ;;  %vm136_vm3 = vcmask 781312  }
  0x28   :  { %169 = vmatpush3.bf16.msra.mxu0 %v183_v1  ;;  %s264_s1 = smov [#allocation8]  }
  0x29   :  { %170 = vmatprep.subr.bf16.mxu0 %v262_v0  ;;  %s144_s6 = sshll.u32 %s264_s1, 4  ;;  %s145_s6 = int_to_ptr.vmem [resolvable:$true] %s144_s6 }
  0x2a   :  { %s230_s7 = scalar_lea.vmem %s145_s6, 128  ;;  %p235_p3 = scmp.lt.s32.totalorder %s145_s6, %s145_s6 }
  0x2b   :  { %p231_p2 = scmp.ne.s32.totalorder %s145_s6, %s230_s7  ;;  %p236_p4 = scmp.lt.s32.totalorder %s230_s7, %s230_s7 }
  0x2c   :  { %171 = vmatpush3.bf16.msra.mxu0 %v184_v2 }
  0x2d   :  { %p237_p5 = por %p236_p4, %p235_p3 }
  0x2e   :  { %v48_v4 = vld [vmem:[#allocation2] sm:$0xff]  ;;  %v49_v6 = vld [vmem:[#allocation2 + $0x8] sm:$0xff] }
  0x2f   :  { %173 = vmatmul.mubr.msk.bf16.vlgmr.msra.gmra.mrb[0].mxu0 %vm73_vm2, %v185_v3  ;;  %p238_p6 = pnand %p237_p5, %p231_p2 }
 0x102   :  { %v111_v5 = vpop.f32.mrb[0].mxu0 }
 0x103   :  { %v118_v7 = vadd.f32 %v111_v5, %v48_v4  ;;  %v174_v8 = vpop.f32.mrb[1].mxu0 }
 0x104   :  { %v114_v9 = vpop.f32.mrb[2].mxu0 }
 0x105   :  { %121 = vst.msk [vmem:[#allocation2] sm:$0xff] %vm45_vm0, %v118_v7  ;;  %v119_v10 = vadd.f32 %v114_v9, %v49_v6  ;;  %v175_v11 = vpop.f32.mrb[3].mxu0 }
 0x107   :  { %122 = vst.msk [vmem:[#allocation2 + $0x8] sm:$0xff] %vm45_vm0, %v119_v10 }
 0x10c   :  { %v126_v12 = vld [vmem:[#allocation2] sm:$0xff] }
 0x10d   :  { %v163_v13 = vpack.c.bf16 %v126_v12, %v126_v12 }
 0x10e   :  { %v127_v14 = vld [vmem:[#allocation2 + $0x8] sm:$0xff] }
 0x10f   :  { %v164_v15 = vpack.c.bf16 %v127_v14, %v127_v14  ;;  %137 = vst.msk [vmem:[#allocation8] sm:$0xf] %vm136_vm3, %v163_v13 }
 0x111   :  { %138 = vst.msk [vmem:[#allocation8 + $0x4] sm:$0xf] %vm136_vm3, %v164_v15 }
 0x112   :  { %241 = shalt.err (!%p238_p6)
}
 0x113   :  { %s242_s10 = scalar_lea.hbm %s331_s2, 128 }
 0x114   :  { %p243_p7 = scmp.ne.s32.totalorder %s331_s2, %s242_s10  ;;  %p246_p8 = scmp.lt.u32.totalorder %s242_s10, %s331_s2 }
 0x116   :  { %p248_p9 = pnand %p246_p8, %p243_p7 }
 0x118   :  { %251 = shalt.err (!%p248_p9)
}
 0x119   :  { %150 = dma.vmem_to_hbm [thread:$0]  %s145_s6, 128, %s331_s2, [#allocation5], %s259_s19, %s259_s19, %s260_s20  }
 0x11a   :  { %256 = dma.done.wait [#allocation5], 128  }
 0x11b   :  { %257 = vsyncadd [#allocation5], 4294967168 }
 0x11c   :  { %154 = vsyncpa [#allocation4], 1 }
 0x11d   :  { %155 = vsyncpa [#allocation7], 1 }
 0x11e   :  { %156 = vsyncpa [#allocation5], 1 }

</bundles_post_ra>
